<compile_context>
chip_gen: v5e
topology: v5e:2x2
jax: 0.10.0
libtpu: 0.0.40
codegen_flags: <defaults>
</compile_context>

<pallas_src>
import jax
import jax.numpy as jnp
import numpy as np
from jax import lax
from jax.experimental import pallas as pl
from jax.experimental.pallas import tpu as pltpu


def _round_up(x, m):
    return (x + m - 1) // m * m


def _user_encoder_kernel(idx_ref, emb_ref, wf_ref, bf_ref, out_ref, x_scratch):
    """One batch tile.

    idx_ref   : SMEM (B_pad,) int32   -- scalar-prefetched user indices
    emb_ref   : VMEM (U, E)           -- full embedding table (resident)
    wf_ref    : VMEM (E, Np)          -- fused, lane-padded [W1 | W2 | 0]
    bf_ref    : VMEM (1, Np)          -- fused, lane-padded [b1 | b2 | 0]
    out_ref   : VMEM (tb, Np)         -- relu(x @ Wf + bf), lane-dense store
    x_scratch : VMEM (tb, E)          -- gathered embedding rows
    """
    i = pl.program_id(0)
    tb = x_scratch.shape[0]
    base = i * tb

    def gather_row(r, carry):
        u = idx_ref[base + r]                                 # scalar from SMEM
        x_scratch[pl.ds(r, 1), :] = emb_ref[pl.ds(u, 1), :]   # exact (1, E) row copy
        return carry

    # Unroll short gathers so the LLO scheduler can interleave the copies.
    lax.fori_loop(0, tb, gather_row, 0, unroll=(tb <= 32))

    h = jnp.dot(x_scratch[...], wf_ref[...],
                preferred_element_type=jnp.float32) + bf_ref[...]
    out_ref[...] = jnp.maximum(h, 0.0).astype(out_ref.dtype)


def user_embedding_encoder_forward(user_index, emb_table, w1, b1, w2, b2,
                                    *, batch_tile=None):
    """Embedding gather + two fused FC+ReLU heads inside one Pallas kernel.

    w1/w2 are stored pre-transposed as (E, Q) (PyTorch Linear stores (Q, E));
    b1/b2 are (Q,).  Returns (y1, y2), each (B, Q).
    """
    B = user_index.shape[0]
    U, E = emb_table.shape
    Q = w1.shape[1]
    two_q = 2 * Q
    # Lane-dense fused head: pad 2Q up to a multiple of 128 with zero columns
    # so the output store is an unmasked full-lane `vst`.
    n_pad = _round_up(two_q, 128)

    wf = jnp.concatenate([w1, w2], axis=1)                      # (E, 2Q)
    bf = jnp.concatenate([b1, b2], axis=0).reshape(1, two_q)    # (1, 2Q)
    if n_pad != two_q:
        wf = jnp.pad(wf, ((0, 0), (0, n_pad - two_q)))          # (E, Np)
        bf = jnp.pad(bf, ((0, 0), (0, n_pad - two_q)))          # (1, Np)

    # Large batch tiles: amortize per-grid-step overhead and fill MXU rows.
    # Cap at 256 so big B keeps >=2 grid steps (megacore) and the per-tile
    # VMEM footprint stays small on v7x's 64 MiB.
    if batch_tile is None:
        batch_tile = min(256, _round_up(B, 8))
    tb = batch_tile
    b_pad = _round_up(B, tb)

    idx = user_index.astype(jnp.int32)
    if b_pad != B:
        idx = jnp.pad(idx, (0, b_pad - B))                      # pad rows gather row 0
    grid = (b_pad // tb,)

    out = pl.pallas_call(
        _user_encoder_kernel,
        out_shape=jax.ShapeDtypeStruct((b_pad, n_pad), emb_table.dtype),
        grid_spec=pltpu.PrefetchScalarGridSpec(
            num_scalar_prefetch=1,
            grid=grid,
            in_specs=[
                # Full embedding table resident in VMEM (constant index_map,
                # DMA'd once and reused across the whole grid).
                # TODO(synk): for production-sized user_num that does not fit
                # VMEM, switch to memory_space=pl.ANY + per-row
                # pltpu.make_async_copy gather from HBM.
                pl.BlockSpec((U, E), lambda i, _: (0, 0)),
                pl.BlockSpec((E, n_pad), lambda i, _: (0, 0)),   # fused weights
                pl.BlockSpec((1, n_pad), lambda i, _: (0, 0)),   # fused bias
            ],
            out_specs=pl.BlockSpec((tb, n_pad), lambda i, _: (i, 0)),
            scratch_shapes=[pltpu.VMEM((tb, E), emb_table.dtype)],
        ),
        compiler_params=pltpu.CompilerParams(
            dimension_semantics=("parallel",),
        ),
    )(idx, emb_table, wf, bf)

    y1 = out[:B, :Q]
    y2 = out[:B, Q:two_q]
    return y1, y2


def _reference_forward(user_index, emb_table, w1, b1, w2, b2):
    x = jnp.take(emb_table, user_index, axis=0)
    y1 = jax.nn.relu(x @ w1 + b1)
    y2 = jax.nn.relu(x @ w2 + b2)
    return y1, y2


if __name__ == "__main__":
    # Small, deterministic shapes consistent with the module's __init__:
    #   args.user_num=64, args.embedding_dim=32, args.query_vector_dim=32, batch=16
    user_num = 64
    embedding_dim = 32
    query_vector_dim = 32
    batch = 16

    key = jax.random.PRNGKey(0)
    k_emb, k_w1, k_b1, k_w2, k_b2, k_idx = jax.random.split(key, 6)

    # Deterministic synthetic parameters (nn.Embedding / nn.Linear shapes).
    emb_table = jax.random.normal(k_emb, (user_num, embedding_dim), dtype=jnp.float32)
    # PyTorch Linear weight is (out, in); store transposed (in, out) for x @ W.
    fc1_w = jax.random.normal(k_w1, (embedding_dim, query_vector_dim), dtype=jnp.float32) * 0.1
    fc1_b = jax.random.normal(k_b1, (query_vector_dim,), dtype=jnp.float32) * 0.1
    fc2_w = jax.random.normal(k_w2, (embedding_dim, query_vector_dim), dtype=jnp.float32) * 0.1
    fc2_b = jax.random.normal(k_b2, (query_vector_dim,), dtype=jnp.float32) * 0.1

    user_index = jax.random.randint(k_idx, (batch,), 0, user_num, dtype=jnp.int32)

    fwd = jax.jit(user_embedding_encoder_forward)
    y1, y2 = fwd(user_index, emb_table, fc1_w, fc1_b, fc2_w, fc2_b)
    jax.block_until_ready((y1, y2))

    # Quiet correctness check against a pure-JAX reference.
    r1, r2 = _reference_forward(user_index, emb_table, fc1_w, fc1_b, fc2_w, fc2_b)
    assert np.allclose(np.asarray(y1), np.asarray(r1), rtol=1e-5, atol=1e-5)
    assert np.allclose(np.asarray(y2), np.asarray(r2), rtol=1e-5, atol=1e-5)

    print("KERNEL_OK")
</pallas_src>

<mosaic_0001>
module attributes {stable_mosaic.version = 11 : i64} {
  func.func @_user_encoder_kernel(%arg0: i32, %arg1: memref<16xi32, #tpu.memory_space<smem>>, %arg2: memref<64x32xf32, #tpu.memory_space<vmem>>, %arg3: memref<32x128xf32, #tpu.memory_space<vmem>>, %arg4: memref<1x128xf32, #tpu.memory_space<vmem>>, %arg5: memref<16x128xf32, #tpu.memory_space<vmem>>, %arg6: memref<16x32xf32, #tpu.memory_space<vmem>>) attributes {dimension_semantics = [#tpu.dimension_semantics<parallel>], iteration_bounds = array<i64: 1>, scalar_prefetch = 1 : i64, scratch_operands = 1 : i64, tpu.core_type = #tpu.core_type<tc>, window_params = [{pipeline_mode = #tpu.pipeline_mode<synchronous>, transform_indices = @transform_0, window_bounds = array<i64: 64, 32>}, {pipeline_mode = #tpu.pipeline_mode<synchronous>, transform_indices = @transform_1, window_bounds = array<i64: 32, 128>}, {pipeline_mode = #tpu.pipeline_mode<synchronous>, transform_indices = @transform_2, window_bounds = array<i64: 1, 128>}, {transform_indices = @transform_3, window_bounds = array<i64: 16, 128>}]} {
    %c16_i32 = arith.constant 16 : i32
    %0 = arith.muli %arg0, %c16_i32 : i32
    %c0_i32 = arith.constant 0 : i32
    %1 = arith.addi %0, %c0_i32 : i32
    %2 = arith.index_cast %1 : i32 to index
    %3 = memref.load %arg1[%2] : memref<16xi32, #tpu.memory_space<smem>>
    %4 = arith.index_cast %3 : i32 to index
    %c0 = arith.constant 0 : index
    %5 = vector.load %arg2[%4, %c0] : memref<64x32xf32, #tpu.memory_space<vmem>>, vector<1x32xf32>
    %6 = arith.index_cast %c0_i32 : i32 to index
    %c0_0 = arith.constant 0 : index
    %7 = vector.load %arg6[%6, %c0_0] : memref<16x32xf32, #tpu.memory_space<vmem>>, vector<1x32xf32>
    tpu.vector_store %arg6[%6, %c0_0], %5 {strides = array<i32>} : memref<16x32xf32, #tpu.memory_space<vmem>>, vector<1x32xf32>,
    %c1_i32 = arith.constant 1 : i32
    %8 = arith.addi %0, %c1_i32 : i32
    %9 = arith.index_cast %8 : i32 to index
    %10 = memref.load %arg1[%9] : memref<16xi32, #tpu.memory_space<smem>>
    %11 = arith.index_cast %10 : i32 to index
    %c0_1 = arith.constant 0 : index
    %12 = vector.load %arg2[%11, %c0_1] : memref<64x32xf32, #tpu.memory_space<vmem>>, vector<1x32xf32>
    %13 = arith.index_cast %c1_i32 : i32 to index
    %c0_2 = arith.constant 0 : index
    %14 = vector.load %arg6[%13, %c0_2] : memref<16x32xf32, #tpu.memory_space<vmem>>, vector<1x32xf32>
    tpu.vector_store %arg6[%13, %c0_2], %12 {strides = array<i32>} : memref<16x32xf32, #tpu.memory_space<vmem>>, vector<1x32xf32>,
    %c2_i32 = arith.constant 2 : i32
    %15 = arith.addi %0, %c2_i32 : i32
    %16 = arith.index_cast %15 : i32 to index
    %17 = memref.load %arg1[%16] : memref<16xi32, #tpu.memory_space<smem>>
    %18 = arith.index_cast %17 : i32 to index
    %c0_3 = arith.constant 0 : index
    %19 = vector.load %arg2[%18, %c0_3] : memref<64x32xf32, #tpu.memory_space<vmem>>, vector<1x32xf32>
    %20 = arith.index_cast %c2_i32 : i32 to index
    %c0_4 = arith.constant 0 : index
    %21 = vector.load %arg6[%20, %c0_4] : memref<16x32xf32, #tpu.memory_space<vmem>>, vector<1x32xf32>
    tpu.vector_store %arg6[%20, %c0_4], %19 {strides = array<i32>} : memref<16x32xf32, #tpu.memory_space<vmem>>, vector<1x32xf32>,
    %c3_i32 = arith.constant 3 : i32
    %22 = arith.addi %0, %c3_i32 : i32
    %23 = arith.index_cast %22 : i32 to index
    %24 = memref.load %arg1[%23] : memref<16xi32, #tpu.memory_space<smem>>
    %25 = arith.index_cast %24 : i32 to index
    %c0_5 = arith.constant 0 : index
    %26 = vector.load %arg2[%25, %c0_5] : memref<64x32xf32, #tpu.memory_space<vmem>>, vector<1x32xf32>
    %27 = arith.index_cast %c3_i32 : i32 to index
    %c0_6 = arith.constant 0 : index
    %28 = vector.load %arg6[%27, %c0_6] : memref<16x32xf32, #tpu.memory_space<vmem>>, vector<1x32xf32>
    tpu.vector_store %arg6[%27, %c0_6], %26 {strides = array<i32>} : memref<16x32xf32, #tpu.memory_space<vmem>>, vector<1x32xf32>,
    %c4_i32 = arith.constant 4 : i32
    %29 = arith.addi %0, %c4_i32 : i32
    %30 = arith.index_cast %29 : i32 to index
    %31 = memref.load %arg1[%30] : memref<16xi32, #tpu.memory_space<smem>>
    %32 = arith.index_cast %31 : i32 to index
    %c0_7 = arith.constant 0 : index
    %33 = vector.load %arg2[%32, %c0_7] : memref<64x32xf32, #tpu.memory_space<vmem>>, vector<1x32xf32>
    %34 = arith.index_cast %c4_i32 : i32 to index
    %c0_8 = arith.constant 0 : index
    %35 = vector.load %arg6[%34, %c0_8] : memref<16x32xf32, #tpu.memory_space<vmem>>, vector<1x32xf32>
    tpu.vector_store %arg6[%34, %c0_8], %33 {strides = array<i32>} : memref<16x32xf32, #tpu.memory_space<vmem>>, vector<1x32xf32>,
    %c5_i32 = arith.constant 5 : i32
    %36 = arith.addi %0, %c5_i32 : i32
    %37 = arith.index_cast %36 : i32 to index
    %38 = memref.load %arg1[%37] : memref<16xi32, #tpu.memory_space<smem>>
    %39 = arith.index_cast %38 : i32 to index
    %c0_9 = arith.constant 0 : index
    %40 = vector.load %arg2[%39, %c0_9] : memref<64x32xf32, #tpu.memory_space<vmem>>, vector<1x32xf32>
    %41 = arith.index_cast %c5_i32 : i32 to index
    %c0_10 = arith.constant 0 : index
    %42 = vector.load %arg6[%41, %c0_10] : memref<16x32xf32, #tpu.memory_space<vmem>>, vector<1x32xf32>
    tpu.vector_store %arg6[%41, %c0_10], %40 {strides = array<i32>} : memref<16x32xf32, #tpu.memory_space<vmem>>, vector<1x32xf32>,
    %c6_i32 = arith.constant 6 : i32
    %43 = arith.addi %0, %c6_i32 : i32
    %44 = arith.index_cast %43 : i32 to index
    %45 = memref.load %arg1[%44] : memref<16xi32, #tpu.memory_space<smem>>
    %46 = arith.index_cast %45 : i32 to index
    %c0_11 = arith.constant 0 : index
    %47 = vector.load %arg2[%46, %c0_11] : memref<64x32xf32, #tpu.memory_space<vmem>>, vector<1x32xf32>
    %48 = arith.index_cast %c6_i32 : i32 to index
    %c0_12 = arith.constant 0 : index
    %49 = vector.load %arg6[%48, %c0_12] : memref<16x32xf32, #tpu.memory_space<vmem>>, vector<1x32xf32>
    tpu.vector_store %arg6[%48, %c0_12], %47 {strides = array<i32>} : memref<16x32xf32, #tpu.memory_space<vmem>>, vector<1x32xf32>,
    %c7_i32 = arith.constant 7 : i32
    %50 = arith.addi %0, %c7_i32 : i32
    %51 = arith.index_cast %50 : i32 to index
    %52 = memref.load %arg1[%51] : memref<16xi32, #tpu.memory_space<smem>>
    %53 = arith.index_cast %52 : i32 to index
    %c0_13 = arith.constant 0 : index
    %54 = vector.load %arg2[%53, %c0_13] : memref<64x32xf32, #tpu.memory_space<vmem>>, vector<1x32xf32>
    %55 = arith.index_cast %c7_i32 : i32 to index
    %c0_14 = arith.constant 0 : index
    %56 = vector.load %arg6[%55, %c0_14] : memref<16x32xf32, #tpu.memory_space<vmem>>, vector<1x32xf32>
    tpu.vector_store %arg6[%55, %c0_14], %54 {strides = array<i32>} : memref<16x32xf32, #tpu.memory_space<vmem>>, vector<1x32xf32>,
    %c8_i32 = arith.constant 8 : i32
    %57 = arith.addi %0, %c8_i32 : i32
    %58 = arith.index_cast %57 : i32 to index
    %59 = memref.load %arg1[%58] : memref<16xi32, #tpu.memory_space<smem>>
    %60 = arith.index_cast %59 : i32 to index
    %c0_15 = arith.constant 0 : index
    %61 = vector.load %arg2[%60, %c0_15] : memref<64x32xf32, #tpu.memory_space<vmem>>, vector<1x32xf32>
    %62 = arith.index_cast %c8_i32 : i32 to index
    %c0_16 = arith.constant 0 : index
    %63 = vector.load %arg6[%62, %c0_16] : memref<16x32xf32, #tpu.memory_space<vmem>>, vector<1x32xf32>
    tpu.vector_store %arg6[%62, %c0_16], %61 {strides = array<i32>} : memref<16x32xf32, #tpu.memory_space<vmem>>, vector<1x32xf32>,
    %c9_i32 = arith.constant 9 : i32
    %64 = arith.addi %0, %c9_i32 : i32
    %65 = arith.index_cast %64 : i32 to index
    %66 = memref.load %arg1[%65] : memref<16xi32, #tpu.memory_space<smem>>
    %67 = arith.index_cast %66 : i32 to index
    %c0_17 = arith.constant 0 : index
    %68 = vector.load %arg2[%67, %c0_17] : memref<64x32xf32, #tpu.memory_space<vmem>>, vector<1x32xf32>
    %69 = arith.index_cast %c9_i32 : i32 to index
    %c0_18 = arith.constant 0 : index
    %70 = vector.load %arg6[%69, %c0_18] : memref<16x32xf32, #tpu.memory_space<vmem>>, vector<1x32xf32>
    tpu.vector_store %arg6[%69, %c0_18], %68 {strides = array<i32>} : memref<16x32xf32, #tpu.memory_space<vmem>>, vector<1x32xf32>,
    %c10_i32 = arith.constant 10 : i32
    %71 = arith.addi %0, %c10_i32 : i32
    %72 = arith.index_cast %71 : i32 to index
    %73 = memref.load %arg1[%72] : memref<16xi32, #tpu.memory_space<smem>>
    %74 = arith.index_cast %73 : i32 to index
    %c0_19 = arith.constant 0 : index
    %75 = vector.load %arg2[%74, %c0_19] : memref<64x32xf32, #tpu.memory_space<vmem>>, vector<1x32xf32>
    %76 = arith.index_cast %c10_i32 : i32 to index
    %c0_20 = arith.constant 0 : index
    %77 = vector.load %arg6[%76, %c0_20] : memref<16x32xf32, #tpu.memory_space<vmem>>, vector<1x32xf32>
    tpu.vector_store %arg6[%76, %c0_20], %75 {strides = array<i32>} : memref<16x32xf32, #tpu.memory_space<vmem>>, vector<1x32xf32>,
    %c11_i32 = arith.constant 11 : i32
    %78 = arith.addi %0, %c11_i32 : i32
    %79 = arith.index_cast %78 : i32 to index
    %80 = memref.load %arg1[%79] : memref<16xi32, #tpu.memory_space<smem>>
    %81 = arith.index_cast %80 : i32 to index
    %c0_21 = arith.constant 0 : index
    %82 = vector.load %arg2[%81, %c0_21] : memref<64x32xf32, #tpu.memory_space<vmem>>, vector<1x32xf32>
    %83 = arith.index_cast %c11_i32 : i32 to index
    %c0_22 = arith.constant 0 : index
    %84 = vector.load %arg6[%83, %c0_22] : memref<16x32xf32, #tpu.memory_space<vmem>>, vector<1x32xf32>
    tpu.vector_store %arg6[%83, %c0_22], %82 {strides = array<i32>} : memref<16x32xf32, #tpu.memory_space<vmem>>, vector<1x32xf32>,
    %c12_i32 = arith.constant 12 : i32
    %85 = arith.addi %0, %c12_i32 : i32
    %86 = arith.index_cast %85 : i32 to index
    %87 = memref.load %arg1[%86] : memref<16xi32, #tpu.memory_space<smem>>
    %88 = arith.index_cast %87 : i32 to index
    %c0_23 = arith.constant 0 : index
    %89 = vector.load %arg2[%88, %c0_23] : memref<64x32xf32, #tpu.memory_space<vmem>>, vector<1x32xf32>
    %90 = arith.index_cast %c12_i32 : i32 to index
    %c0_24 = arith.constant 0 : index
    %91 = vector.load %arg6[%90, %c0_24] : memref<16x32xf32, #tpu.memory_space<vmem>>, vector<1x32xf32>
    tpu.vector_store %arg6[%90, %c0_24], %89 {strides = array<i32>} : memref<16x32xf32, #tpu.memory_space<vmem>>, vector<1x32xf32>,
    %c13_i32 = arith.constant 13 : i32
    %92 = arith.addi %0, %c13_i32 : i32
    %93 = arith.index_cast %92 : i32 to index
    %94 = memref.load %arg1[%93] : memref<16xi32, #tpu.memory_space<smem>>
    %95 = arith.index_cast %94 : i32 to index
    %c0_25 = arith.constant 0 : index
    %96 = vector.load %arg2[%95, %c0_25] : memref<64x32xf32, #tpu.memory_space<vmem>>, vector<1x32xf32>
    %97 = arith.index_cast %c13_i32 : i32 to index
    %c0_26 = arith.constant 0 : index
    %98 = vector.load %arg6[%97, %c0_26] : memref<16x32xf32, #tpu.memory_space<vmem>>, vector<1x32xf32>
    tpu.vector_store %arg6[%97, %c0_26], %96 {strides = array<i32>} : memref<16x32xf32, #tpu.memory_space<vmem>>, vector<1x32xf32>,
    %c14_i32 = arith.constant 14 : i32
    %99 = arith.addi %0, %c14_i32 : i32
    %100 = arith.index_cast %99 : i32 to index
    %101 = memref.load %arg1[%100] : memref<16xi32, #tpu.memory_space<smem>>
    %102 = arith.index_cast %101 : i32 to index
    %c0_27 = arith.constant 0 : index
    %103 = vector.load %arg2[%102, %c0_27] : memref<64x32xf32, #tpu.memory_space<vmem>>, vector<1x32xf32>
    %104 = arith.index_cast %c14_i32 : i32 to index
    %c0_28 = arith.constant 0 : index
    %105 = vector.load %arg6[%104, %c0_28] : memref<16x32xf32, #tpu.memory_space<vmem>>, vector<1x32xf32>
    tpu.vector_store %arg6[%104, %c0_28], %103 {strides = array<i32>} : memref<16x32xf32, #tpu.memory_space<vmem>>, vector<1x32xf32>,
    %c15_i32 = arith.constant 15 : i32
    %106 = arith.addi %0, %c15_i32 : i32
    %107 = arith.index_cast %106 : i32 to index
    %108 = memref.load %arg1[%107] : memref<16xi32, #tpu.memory_space<smem>>
    %109 = arith.index_cast %108 : i32 to index
    %c0_29 = arith.constant 0 : index
    %110 = vector.load %arg2[%109, %c0_29] : memref<64x32xf32, #tpu.memory_space<vmem>>, vector<1x32xf32>
    %111 = arith.index_cast %c15_i32 : i32 to index
    %c0_30 = arith.constant 0 : index
    %112 = vector.load %arg6[%111, %c0_30] : memref<16x32xf32, #tpu.memory_space<vmem>>, vector<1x32xf32>
    tpu.vector_store %arg6[%111, %c0_30], %110 {strides = array<i32>} : memref<16x32xf32, #tpu.memory_space<vmem>>, vector<1x32xf32>,
    %c16_i32_31 = arith.constant 16 : i32
    %c0_32 = arith.constant 0 : index
    %c0_33 = arith.constant 0 : index
    %113 = vector.load %arg6[%c0_32, %c0_33] : memref<16x32xf32, #tpu.memory_space<vmem>>, vector<16x32xf32>
    %c0_34 = arith.constant 0 : index
    %c0_35 = arith.constant 0 : index
    %114 = vector.load %arg3[%c0_34, %c0_35] : memref<32x128xf32, #tpu.memory_space<vmem>>, vector<32x128xf32>
    %cst = arith.constant dense<0.000000e+00> : vector<16x128xf32>
    %115 = tpu.matmul %113, %114, %cst {dimension_numbers = #tpu.dot_dimension_numbers<[1], [0], [0], [1], [0, 0, 1, 1], [], []>} : vector<16x32xf32>, vector<32x128xf32>, vector<16x128xf32> -> vector<16x128xf32>
    %c0_36 = arith.constant 0 : index
    %c0_37 = arith.constant 0 : index
    %116 = vector.load %arg4[%c0_36, %c0_37] : memref<1x128xf32, #tpu.memory_space<vmem>>, vector<1x128xf32>
    %117 = vector.broadcast %116 : vector<1x128xf32> to vector<16x128xf32>
    %118 = arith.addf %115, %117 : vector<16x128xf32>
    %cst_38 = arith.constant 0.000000e+00 : f32
    %119 = vector.broadcast %cst_38 : f32 to vector<16x128xf32>
    %120 = arith.maximumf %118, %119 : vector<16x128xf32>
    %c0_39 = arith.constant 0 : index
    %c0_40 = arith.constant 0 : index
    %121 = vector.load %arg5[%c0_39, %c0_40] : memref<16x128xf32, #tpu.memory_space<vmem>>, vector<16x128xf32>
    tpu.vector_store %arg5[%c0_39, %c0_40], %120 {strides = array<i32>} : memref<16x128xf32, #tpu.memory_space<vmem>>, vector<16x128xf32>,
    return
  }
  func.func @transform_0(%arg0: i32, %arg1: memref<16xi32, #tpu.memory_space<smem>>) -> (i32, i32) {
    %c0_i32 = arith.constant 0 : i32
    %c0_i32_0 = arith.constant 0 : i32
    %c0_i32_1 = arith.constant 0 : i32
    return %c0_i32, %c0_i32_0 : i32, i32
  }
  func.func @transform_1(%arg0: i32, %arg1: memref<16xi32, #tpu.memory_space<smem>>) -> (i32, i32) {
    %c0_i32 = arith.constant 0 : i32
    %c0_i32_0 = arith.constant 0 : i32
    %c0_i32_1 = arith.constant 0 : i32
    return %c0_i32, %c0_i32_0 : i32, i32
  }
  func.func @transform_2(%arg0: i32, %arg1: memref<16xi32, #tpu.memory_space<smem>>) -> (i32, i32) {
    %c0_i32 = arith.constant 0 : i32
    %c0_i32_0 = arith.constant 0 : i32
    %c0_i32_1 = arith.constant 0 : i32
    return %c0_i32, %c0_i32_0 : i32, i32
  }
  func.func @transform_3(%arg0: i32, %arg1: memref<16xi32, #tpu.memory_space<smem>>) -> (i32, i32) {
    %c0_i32 = arith.constant 0 : i32
    %c0_i32_0 = arith.constant 0 : i32
    return %arg0, %c0_i32 : i32, i32
  }
}

</mosaic_0001>

<bundles_post_ra>
// kernel: user_embedding_encoder_forward.1
= control target key start
LH: loop header
LB: loop body
LE: loop exit
PB: predicated region body
PF: predicated region fallthrough
CT: control target
= control target key end

     0   :  { %s205_s18 = smov [#allocation4]   ;;  %s319_s0 = inlined_call_operand.vmem [shape: s32[16], index: 0, kind: input, shape index: {}]   ;;  %s320_s1 = inlined_call_operand.vmem [shape: f32[64,32], index: 1, kind: input, shape index: {}]   ;;  %s321_s2 = inlined_call_operand.vmem [shape: f32[32,128], index: 2, kind: input, shape index: {}]   ;;  %s322_s3 = inlined_call_operand.vmem [shape: f32[1,128], index: 3, kind: input, shape index: {}]   ;;  %s323_s4 = inlined_call_operand.vmem [shape: f32[16,128], index: 4, kind: output, shape index: {}]  }
   0x1   :  { %s10_s17 = sshll.u32 %s319_s0, 4  ;;  %s11_s17 = int_to_ptr.vmem [resolvable:$true] %s10_s17 }
   0x2   :  { %13 = dma.vmem_to_smem %s11_s17, 16, %s205_s18, [#allocation3] }
   0x3   :  { %203 = dma.done.wait [#allocation3], 16 }
   0x4   :  { %204 = vsyncadd [#allocation3], 4294967280 }
   0x5   :  { %16 = sfence }
   0x6   :  { %v109_v0 = vld [vmem:[%s321_s2 + $0x18] sm:$0xff]  ;;  %v108_v1 = vld [vmem:[%s321_s2 + $0x10] sm:$0xff]  ;;  %s24_s23 = sld [smem:[#allocation4]]  ;;  %v107_v2 = vld [vmem:[%s321_s2 + $0x8] sm:$0xff]  ;;  %vm27_vm0 = vcmask 253952   ;;  %vm114_vm1 = vcmask 261120  }
   0x7   :  { %133 = vmatpush.msra.mxu0 %v109_v0  ;;  %185 = vmatpush.msra.mxu1 %v109_v0  ;;  %s168_s24 = sld [smem:[#allocation4 + $0x1]]  ;;  %v106_v3 = vld [vmem:[%s321_s2] sm:$0xff] }
   0x8   :  { %s169_s26 = sld [smem:[#allocation4 + $0x2]]  ;;  %v190_v22 = vld [vmem:[%s322_s3] ss:$0 sm:$0xff] }
   0x9   :  { %134 = vmatpush.msra.mxu0 %v108_v1  ;;  %186 = vmatpush.msra.mxu1 %v108_v1  ;;  %s170_s27 = sld [smem:[#allocation4 + $0x3]] }
   0xa   :  { %s171_s30 = sld [smem:[#allocation4 + $0x4]] }
   0xb   :  { %135 = vmatpush.msra.mxu0 %v107_v2  ;;  %187 = vmatpush.msra.mxu1 %v107_v2  ;;  %s172_s5 = sld [smem:[#allocation4 + $0x5]] }
   0xc   :  { %s25_s8 = scalar_lea.vmem %s320_s1, %s24_s23  ;;  %s173_s9 = sld [smem:[#allocation4 + $0x6]] }
   0xd   :  { %136 = vmatpush.msra.mxu0 %v106_v3  ;;  %188 = vmatpush.msra.mxu1 %v106_v3  ;;  %v26_v4 = vld [vmem:[%s25_s8] sm:$0x1]  ;;  %s31_s12 = scalar_lea.vmem %s320_s1, %s168_s24  ;;  %s174_s13 = sld [smem:[#allocation4 + $0x7]] }
   0xe   :  { %28 = vst.msk [vmem:[#allocation2] sm:$0x1] %vm27_vm0, %v26_v4  ;;  %v32_v5 = vld [vmem:[%s31_s12] sm:$0x1]  ;;  %s36_s15 = scalar_lea.vmem %s320_s1, %s169_s26  ;;  %s175_s16 = sld [smem:[#allocation4 + $0x8]] }
   0xf   :  { %33 = vst.msk [vmem:[#allocation2 + $0x1] sm:$0x1] %vm27_vm0, %v32_v5  ;;  %v37_v6 = vld [vmem:[%s36_s15] sm:$0x1]  ;;  %s41_s19 = scalar_lea.vmem %s320_s1, %s170_s27  ;;  %s176_s20 = sld [smem:[#allocation4 + $0x9]] }
  0x10   :  { %38 = vst.msk [vmem:[#allocation2 + $0x2] sm:$0x1] %vm27_vm0, %v37_v6  ;;  %v42_v7 = vld [vmem:[%s41_s19] sm:$0x1]  ;;  %s46_s23 = scalar_lea.vmem %s320_s1, %s171_s30  ;;  %s177_s24 = sld [smem:[#allocation4 + $0xa]] }
  0x11   :  { %43 = vst.msk [vmem:[#allocation2 + $0x3] sm:$0x1] %vm27_vm0, %v42_v7  ;;  %v47_v8 = vld [vmem:[%s46_s23] sm:$0x1]  ;;  %s51_s26 = scalar_lea.vmem %s320_s1, %s172_s5  ;;  %s178_s28 = sld [smem:[#allocation4 + $0xb]] }
  0x12   :  { %48 = vst.msk [vmem:[#allocation2 + $0x4] sm:$0x1] %vm27_vm0, %v47_v8  ;;  %v52_v9 = vld [vmem:[%s51_s26] sm:$0x1]  ;;  %s56_s6 = scalar_lea.vmem %s320_s1, %s173_s9  ;;  %s179_s7 = sld [smem:[#allocation4 + $0xc]] }
  0x13   :  { %53 = vst.msk [vmem:[#allocation2 + $0x5] sm:$0x1] %vm27_vm0, %v52_v9  ;;  %v57_v10 = vld [vmem:[%s56_s6] sm:$0x1]  ;;  %s61_s10 = scalar_lea.vmem %s320_s1, %s174_s13  ;;  %s180_s11 = sld [smem:[#allocation4 + $0xd]] }
  0x14   :  { %58 = vst.msk [vmem:[#allocation2 + $0x6] sm:$0x1] %vm27_vm0, %v57_v10  ;;  %v62_v11 = vld [vmem:[%s61_s10] sm:$0x1]  ;;  %s66_s2 = scalar_lea.vmem %s320_s1, %s175_s16  ;;  %s181_s14 = sld [smem:[#allocation4 + $0xe]] }
  0x15   :  { %63 = vst.msk [vmem:[#allocation2 + $0x7] sm:$0x1] %vm27_vm0, %v62_v11  ;;  %v67_v12 = vld [vmem:[%s66_s2] sm:$0x1]  ;;  %s71_s17 = scalar_lea.vmem %s320_s1, %s176_s20  ;;  %s182_s18 = sld [smem:[#allocation4 + $0xf]] }
  0x16   :  { %68 = vst.msk [vmem:[#allocation2 + $0x8] sm:$0x1] %vm27_vm0, %v67_v12  ;;  %v72_v13 = vld [vmem:[%s71_s17] sm:$0x1]  ;;  %s76_s21 = scalar_lea.vmem %s320_s1, %s177_s24 }
  0x17   :  { %73 = vst.msk [vmem:[#allocation2 + $0x9] sm:$0x1] %vm27_vm0, %v72_v13  ;;  %v77_v14 = vld [vmem:[%s76_s21] sm:$0x1]  ;;  %s81_s23 = scalar_lea.vmem %s320_s1, %s178_s28 }
  0x18   :  { %78 = vst.msk [vmem:[#allocation2 + $0xa] sm:$0x1] %vm27_vm0, %v77_v14  ;;  %v82_v15 = vld [vmem:[%s81_s23] sm:$0x1]  ;;  %s86_s0 = scalar_lea.vmem %s320_s1, %s179_s7 }
  0x19   :  { %83 = vst.msk [vmem:[#allocation2 + $0xb] sm:$0x1] %vm27_vm0, %v82_v15  ;;  %v87_v16 = vld [vmem:[%s86_s0] sm:$0x1]  ;;  %s91_s24 = scalar_lea.vmem %s320_s1, %s180_s11 }
  0x1a   :  { %88 = vst.msk [vmem:[#allocation2 + $0xc] sm:$0x1] %vm27_vm0, %v87_v16  ;;  %v92_v17 = vld [vmem:[%s91_s24] sm:$0x1]  ;;  %s96_s6 = scalar_lea.vmem %s320_s1, %s181_s14 }
  0x1b   :  { %93 = vst.msk [vmem:[#allocation2 + $0xd] sm:$0x1] %vm27_vm0, %v92_v17  ;;  %v97_v18 = vld [vmem:[%s96_s6] sm:$0x1]  ;;  %s101_s8 = scalar_lea.vmem %s320_s1, %s182_s18 }
  0x1c   :  { %v104_v19 = vld [vmem:[#allocation2] sm:$0xff]  ;;  %98 = vst.msk [vmem:[#allocation2 + $0xe] sm:$0x1] %vm27_vm0, %v97_v18 }
  0x1d   :  { %v102_v20 = vld [vmem:[%s101_s8] sm:$0x1]  ;;  %183 = vmatmul.msk.f32.vlgmr.msra.gmra.mxu0 %vm114_vm1, %v104_v19 }
  0x1e   :  { %103 = vst.msk [vmem:[#allocation2 + $0xf] sm:$0x1] %vm27_vm0, %v102_v20 }
  0x25   :  { %v105_v21 = vld [vmem:[#allocation2 + $0x8] sm:$0xff] }
  0x26   :  { %184 = vmatmul.msk.f32.vlgmr.msra.gmra.mxu1 %vm114_vm1, %v105_v21 }
  0x9a   :  { %v138_v23 = vpop.f32.mrf.mxu0 }
  0x9b   :  { %v139_v24 = vadd.f32 %v190_v22, %v138_v23 }
  0x9d   :  { %v144_v25 = vmax.f32 %v139_v24, 0.0 }
  0x9f   :  { %146 = vst [vmem:[%s323_s4] sm:$0xff] %v144_v25 }
  0xa3   :  { %v141_v26 = vpop.f32.mrf.mxu1 }
  0xa4   :  { %v142_v27 = vadd.f32 %v190_v22, %v141_v26 }
  0xa6   :  { %v145_v28 = vmax.f32 %v142_v27, 0.0 }
  0xa8   :  { %147 = vst [vmem:[%s323_s4 + $0x8] sm:$0xff] %v145_v28 }

</bundles_post_ra>
